<compile_context>
chip_gen: v6e
topology: v6e:2x2x1
jax: 0.10.0
libtpu: 0.0.40
codegen_flags: <defaults>
</compile_context>

<pallas_src>
import functools

import jax
import jax.numpy as jnp
from jax import lax
from jax.experimental import pallas as pl
from jax.experimental.pallas import tpu as pltpu


def _lse_kernel_single(x_ref, o_ref):
    """One grid step reduces the full H*W extent for a tile of rows."""
    x = x_ref[...].astype(jnp.float32)
    m = jnp.max(x, axis=-1, keepdims=True)                 # (row_tile, 1)
    s = jnp.sum(jnp.exp(x - m), axis=-1, keepdims=True)    # (row_tile, 1)
    o_ref[...] = (m + jnp.log(s)).astype(o_ref.dtype)


def _lse_kernel_tiled(x_ref, o_ref, m_sc, s_sc, *, hw, hw_tile, has_tail):
    """Online (streaming) logsumexp over a tiled H*W axis."""
    k = pl.program_id(1)

    @pl.when(k == 0)
    def _():
        m_sc[...] = jnp.full_like(m_sc, -jnp.inf)
        s_sc[...] = jnp.zeros_like(s_sc)

    x = x_ref[...].astype(jnp.float32)
    if has_tail:
        # Mask out-of-bounds tail columns (hw % hw_tile != 0) to -inf so the
        # padded garbage never contributes to max / sum-exp.  Only emitted
        # when a remainder actually exists (static check).
        col = k * hw_tile + lax.broadcasted_iota(jnp.int32, x.shape, 1)
        x = jnp.where(col < hw, x, -jnp.inf)

    m_new = jnp.maximum(m_sc[...], jnp.max(x, axis=-1, keepdims=True))
    alpha = jnp.exp(m_sc[...] - m_new)
    s_sc[...] = alpha * s_sc[...] + jnp.sum(jnp.exp(x - m_new), axis=-1,
                                            keepdims=True)
    m_sc[...] = m_new

    @pl.when(k == pl.num_programs(1) - 1)
    def _():
        o_ref[...] = (m_sc[...] + jnp.log(s_sc[...])).astype(o_ref.dtype)


# Sublane alignment per dtype width (f32 -> 8 rows, bf16 -> 16, int8/fp8 -> 32).
_ROW_ALIGN = {4: 8, 2: 16, 1: 32}


def _round_down(v, m):
    return max(m, (v // m) * m)


def pool_lse(x, *, vmem_budget_bytes=24 * 1024 * 1024,
             _force_hw_tile=None, _force_row_tile=None):
    """torch.logsumexp(x, (-2, -1), keepdim=True) for an NCHW input."""
    n, c, h, w = x.shape
    nc, hw = n * c, h * w
    x2 = x.reshape(nc, hw)

    itemsize = jnp.dtype(x.dtype).itemsize
    row_align = _ROW_ALIGN.get(itemsize, 8)
    per_buf = vmem_budget_bytes // 2          # inputs are double-buffered

    out_shape = jax.ShapeDtypeStruct((nc, 1), x.dtype)
    cost = pl.CostEstimate(
        flops=2 * nc * hw,
        transcendentals=nc * hw,
        bytes_accessed=nc * hw * itemsize + nc * itemsize,
    )

    single_pass = (_force_hw_tile is None
                   and row_align * hw * itemsize <= per_buf)

    if single_pass:
        # Largest aligned row tile that keeps one input buffer under budget.
        # Big blocks matter: this kernel is HBM-read-bound, so fewer, larger
        # grid steps (~0.35 us per-step overhead) push it toward roofline.
        row_cap = max(row_align, per_buf // max(1, hw * itemsize))
        row_tile = _round_down(min(row_cap, 4096), row_align)
        if _force_row_tile is not None:
            row_tile = _force_row_tile
        if nc <= row_tile:
            row_tile = nc                      # full-dim exception to 8-row rule
        elif _force_row_tile is None:
            row_tile = min(row_tile, _round_down(nc, row_align))

        grid = (pl.cdiv(nc, row_tile),)
        in_bytes = row_tile * hw * itemsize
        vmem_limit = int(2 * in_bytes + 2 * row_tile * itemsize + (4 << 20))

        out = pl.pallas_call(
            _lse_kernel_single,
            out_shape=out_shape,
            grid_spec=pltpu.PrefetchScalarGridSpec(
                num_scalar_prefetch=0,
                grid=grid,
                in_specs=[pl.BlockSpec((row_tile, hw), lambda i: (i, 0))],
                out_specs=pl.BlockSpec((row_tile, 1), lambda i: (i, 0)),
            ),
            compiler_params=pltpu.CompilerParams(
                dimension_semantics=("parallel",),
                vmem_limit_bytes=vmem_limit),
            cost_estimate=cost,
        )(x2)
    else:
        # H*W too large for one VMEM block: tile the reduction axis (last,
        # "arbitrary") and accumulate an online LSE in VMEM scratch.
        row_tile = nc if nc <= row_align else min(
            256, _round_down(nc, row_align))
        if _force_hw_tile is not None:
            hw_tile = _force_hw_tile
        else:
            hw_tile = _round_down(per_buf // (row_tile * itemsize), 128)
            if hw >= 128:
                hw_tile = min(hw_tile, _round_down(hw, 128))
            else:
                hw_tile = hw

        has_tail = (hw % hw_tile) != 0
        grid = (pl.cdiv(nc, row_tile), pl.cdiv(hw, hw_tile))
        in_bytes = row_tile * hw_tile * itemsize
        vmem_limit = int(2 * in_bytes + 8 * row_tile * 4
                         + 2 * row_tile * itemsize + (4 << 20))

        kernel = functools.partial(_lse_kernel_tiled, hw=hw, hw_tile=hw_tile,
                                   has_tail=has_tail)
        out = pl.pallas_call(
            kernel,
            out_shape=out_shape,
            grid_spec=pltpu.PrefetchScalarGridSpec(
                num_scalar_prefetch=0,
                grid=grid,
                in_specs=[pl.BlockSpec((row_tile, hw_tile),
                                       lambda i, k: (i, k))],
                out_specs=pl.BlockSpec((row_tile, 1), lambda i, k: (i, 0)),
                scratch_shapes=[pltpu.VMEM((row_tile, 1), jnp.float32),
                                pltpu.VMEM((row_tile, 1), jnp.float32)],
            ),
            compiler_params=pltpu.CompilerParams(
                dimension_semantics=("parallel", "arbitrary"),
                vmem_limit_bytes=vmem_limit),
            cost_estimate=cost,
        )(x2)

    return out.reshape(n, c, 1, 1)


if __name__ == "__main__":
    key = jax.random.PRNGKey(0)
    k0, k1, k2 = jax.random.split(key, 3)

    # Small NCHW input — exercises the single-pass path (one grid step).
    x = jax.random.normal(k0, (2, 4, 16, 16), dtype=jnp.float32)
    y = pool_lse(x)
    jax.block_until_ready(y)
    ref = jax.scipy.special.logsumexp(x, axis=(-2, -1), keepdims=True)
    assert y.shape == (2, 4, 1, 1)
    assert jnp.allclose(y, ref, atol=1e-5, rtol=1e-5)

    # Online-LSE (tiled H*W) path, including a non-divisible tail
    # (576 % 256 != 0) that must be masked to -inf.
    x2 = jax.random.normal(k1, (2, 4, 24, 24), dtype=jnp.float32)
    y2 = pool_lse(x2, _force_hw_tile=256)
    jax.block_until_ready(y2)
    ref2 = jax.scipy.special.logsumexp(x2, axis=(-2, -1), keepdims=True)
    assert y2.shape == (2, 4, 1, 1)
    assert jnp.allclose(y2, ref2, atol=1e-5, rtol=1e-5)

    # Single-pass path with a partial trailing row block (24 % 16 != 0):
    # checks masked partial output stores on the row axis.
    x3 = jax.random.normal(k2, (3, 8, 16, 16), dtype=jnp.float32)
    y3 = pool_lse(x3, _force_row_tile=16)
    jax.block_until_ready(y3)
    ref3 = jax.scipy.special.logsumexp(x3, axis=(-2, -1), keepdims=True)
    assert y3.shape == (3, 8, 1, 1)
    assert jnp.allclose(y3, ref3, atol=1e-5, rtol=1e-5)

    print("KERNEL_OK")
</pallas_src>

<mosaic_0001>
module attributes {stable_mosaic.version = 11 : i64} {
  func.func @_lse_kernel_single(%arg0: i32, %arg1: memref<8x256xf32, #tpu.memory_space<vmem>>, %arg2: memref<8x1xf32, #tpu.memory_space<vmem>>) attributes {dimension_semantics = [#tpu.dimension_semantics<parallel>], iteration_bounds = array<i64: 1>, scalar_prefetch = 0 : i64, scratch_operands = 0 : i64, tpu.core_type = #tpu.core_type<tc>, window_params = [{transform_indices = @transform_0, window_bounds = array<i64: 8, 256>}, {transform_indices = @transform_1, window_bounds = array<i64: 8, 1>}]} {
    %c0 = arith.constant 0 : index
    %c0_0 = arith.constant 0 : index
    %0 = vector.load %arg1[%c0, %c0_0] : memref<8x256xf32, #tpu.memory_space<vmem>>, vector<8x256xf32>
    %cst = arith.constant dense<0xFF800000> : vector<8xf32>
    %1 = vector.multi_reduction <maximumf>, %0, %cst [1] : vector<8x256xf32> to vector<8xf32>
    %2 = vector.shape_cast %1 : vector<8xf32> to vector<8x1xf32>
    %3 = vector.broadcast %2 : vector<8x1xf32> to vector<8x256xf32>
    %4 = arith.subf %0, %3 : vector<8x256xf32>
    %5 = math.exp %4 : vector<8x256xf32>
    %cst_1 = arith.constant dense<0.000000e+00> : vector<8xf32>
    %6 = vector.multi_reduction <add>, %5, %cst_1 [1] : vector<8x256xf32> to vector<8xf32>
    %7 = vector.shape_cast %6 : vector<8xf32> to vector<8x1xf32>
    %8 = math.log %7 : vector<8x1xf32>
    %9 = arith.addf %2, %8 : vector<8x1xf32>
    %c0_2 = arith.constant 0 : index
    %c0_3 = arith.constant 0 : index
    %10 = vector.load %arg2[%c0_2, %c0_3] : memref<8x1xf32, #tpu.memory_space<vmem>>, vector<8x1xf32>
    tpu.vector_store %arg2[%c0_2, %c0_3], %9 {strides = array<i32>} : memref<8x1xf32, #tpu.memory_space<vmem>>, vector<8x1xf32>,
    return
  }
  func.func @transform_0(%arg0: i32) -> (i32, i32) {
    %c0_i32 = arith.constant 0 : i32
    %c0_i32_0 = arith.constant 0 : i32
    return %arg0, %c0_i32 : i32, i32
  }
  func.func @transform_1(%arg0: i32) -> (i32, i32) {
    %c0_i32 = arith.constant 0 : i32
    %c0_i32_0 = arith.constant 0 : i32
    return %arg0, %c0_i32 : i32, i32
  }
}

</mosaic_0001>

<bundles_post_ra>
// kernel: tpu_custom_call.1
= control target key start
LH: loop header
LB: loop body
LE: loop exit
PB: predicated region body
PF: predicated region fallthrough
CT: control target
= control target key end

     0   :  { %6 = vsyncpa [#allocation3], 0  ;;  %s73_s6 = smov [#allocation2]   ;;  %s90_s0 = inlined_call_operand.hbm [shape: f32[8,256], index: 0, kind: input, shape index: {}]   ;;  %s91_s1 = inlined_call_operand.vmem [shape: f32[8,1], index: 1, kind: output, shape index: {}]  }
   0x1   :  { %s13_s7 = sshll.u32 %s73_s6, 4  ;;  %s14_s7 = int_to_ptr.vmem [resolvable:$true] %s13_s7 }
   0x2   :  { %s59_s8 = scalar_lea.vmem %s14_s7, 256  ;;  %p64_p1 = scmp.lt.s32.totalorder %s14_s7, %s14_s7 }
   0x3   :  { %p60_p0 = scmp.ne.s32.totalorder %s14_s7, %s59_s8  ;;  %p65_p2 = scmp.lt.s32.totalorder %s59_s8, %s59_s8 }
   0x5   :  { %p66_p3 = por %p65_p2, %p64_p1 }
   0x7   :  { %p67_p4 = pnand %p66_p3, %p60_p0 }
   0x9   :  { %70 = shalt.err (!%p67_p4)
}
   0xa   :  { %16 = dma.hbm_to_vmem [thread:$0]  %s90_s0, 256, %s14_s7, [#allocation3]  }
   0xb   :  { %71 = dma.done.wait [#allocation3], 256  }
   0xc   :  { %72 = vsyncadd [#allocation3], 4294967040  ;;  %v20_v0 = vld [vmem:[#allocation2] sm:$0xff]  ;;  %v21_v1 = vld [vmem:[#allocation2 + $0x8] sm:$0xff]  ;;  %vm37_vm0 = vcmask 7168  }
   0xd   :  { %v22_v2 = vmax.f32 %v20_v0, %v21_v1 }
   0xf   :  { %23 = vmax.xlane.f32.xlu0 %v22_v2 }
  0x98   :  { %v24_v3 = vpop.xlane.xlu0 %23 }
  0x99   :  { %v25_v4 = vsub.f32 %v20_v0, %v24_v3  ;;  %v26_v5 = vsub.f32 %v21_v1, %v24_v3 }
  0x9b   :  { %v27_v6 = vmul.f32 1.442695, %v25_v4  ;;  %v29_v7 = vmul.f32 1.442695, %v26_v5 }
  0x9d   :  { %45 = vpow2.f32 %v27_v6 }
  0x9e   :  { %47 = vpow2.f32 %v29_v7 }
  0xaa   :  { %v46_v8 = vpop.eup %45 }
  0xab   :  { %v48_v9 = vpop.eup %47 }
  0xac   :  { %v31_v10 = vadd.f32 %v48_v9, %v46_v8 }
  0xae   :  { %32 = vadd.xlane.f32.xlu0 %v31_v10 }
 0x137   :  { %v33_v11 = vpop.xlane.xlu0 %32 }
 0x138   :  { %49 = vlog2.f32 %v33_v11 }
 0x145   :  { %v50_v12 = vpop.eup %49 }
 0x146   :  { %v35_v13 = vmul.f32 0.6931472, %v50_v12 }
 0x148   :  { %v36_v14 = vadd.f32 %v35_v13, %v24_v3 }
 0x14a   :  { %38 = vst.msk [vmem:[%s91_s1] sm:$0xff] %vm37_vm0, %v36_v14 }
 0x14b   :  { %43 = vsyncpa [#allocation3], 1 }

</bundles_post_ra>
